<compile_context>
chip_gen: v5e
topology: v5e:2x2
jax: 0.10.0
libtpu: 0.0.40
codegen_flags: <defaults>
</compile_context>

<pallas_src>
import numpy as np
import jax
import jax.numpy as jnp
from jax.experimental import pallas as pl
from jax.experimental.pallas import tpu as pltpu

SMOOTH = 1e-5
_LANES = 128


def dice_loss(predict, target, weight=None, *, max_tile_rows=512,
              downcast_logits_to_bf16=False,
              vmem_budget_bytes=32 * 1024 * 1024):
    """Forward pass of DiceLoss (weight=None by default, as in the module).

    predict: float array [N, C, *spatial] (float32 or bfloat16)
    target : int   array [N, *spatial] with class ids in [0, C)
    """
    N, C = predict.shape[:2]
    L = int(np.prod(predict.shape[2:]))

    # HBM dtypes (the kernel is bandwidth bound on v5e/v6e f32): bf16 logits
    # stay bf16 (upcast in-kernel); class ids travel as int8 when C <= 127.
    use_bf16 = (predict.dtype == jnp.bfloat16) or downcast_logits_to_bf16
    p_dtype = jnp.bfloat16 if use_bf16 else jnp.float32
    t_dtype = jnp.int8 if C <= 127 else jnp.int32
    p_bytes = np.dtype(p_dtype).itemsize
    t_bytes = np.dtype(t_dtype).itemsize

    lb = -(-L // _LANES)                      # ceil(L / 128) rows of 128 lanes
    l_pad = lb * _LANES

    pred = predict.reshape(N, C, L).astype(p_dtype)
    tgt = target.reshape(N, L).astype(t_dtype)
    if l_pad != L:
        # TODO(synk): this lane-remainder pad still costs one HBM copy of the
        # logits when L % 128 != 0; a flat (N, C, L) block layout or a manual
        # DMA tail would remove it (common seg shapes are 128-divisible).
        pred = jnp.pad(pred, ((0, 0), (0, 0), (0, l_pad - L)))
        tgt = jnp.pad(tgt, ((0, 0), (0, l_pad - L)))
    pred = pred.reshape(N, C, lb, _LANES)     # free reshape when no pad needed
    tgt = tgt.reshape(N, lb, _LANES)

    # Tile sizing: 2x double-buffered inputs + ~6 live f32 (C, tlb, 128)
    # intermediates per row of 128 positions.  Budget kept well under v7x's
    # 64 MiB physical VMEM (48 MiB scoped limit set below).
    # TODO(synk): very large C (>~512) would need a class-chunked softmax
    # (lax.fori_loop over class blocks) to bound live f32 slabs.
    bytes_per_row = 2 * (C * _LANES * p_bytes + _LANES * t_bytes) + 6 * C * _LANES * 4
    tile_rows = min(max_tile_rows, vmem_budget_bytes // bytes_per_row)
    tile_rows = max(32, (tile_rows // 32) * 32)   # 32: safe for f32/bf16/int8 tiling

    tlb = lb if lb <= tile_rows else tile_rows    # full-dim block is always legal
    num_l = -(-lb // tlb)                         # row-tiles actually containing data

    # v7x has 2 TensorCores: when N alone can't balance them (odd N, e.g. N=1
    # inference), also split the L tiles 2 ways on a leading "parallel" axis.
    splits = 2 if (N % 2 == 1 and num_l >= 2) else 1
    num_l_per = -(-num_l // splits)

    def kernel(pred_ref, tgt_ref, out_ref):
        # pred_ref: (1, C, tlb, 128) logits tile (f32/bf16)
        # tgt_ref : (1, tlb, 128)    class ids tile (int8/int32)
        # out_ref : (1, 1, 3, C, 128) resident accumulator: [inter, sum p^2, onehot]
        sp = pl.program_id(0)
        li = pl.program_id(2)

        @pl.when(li == 0)
        def _init():
            out_ref[...] = jnp.zeros_like(out_ref)

        # Unclamped global row-tile index; the index_map clamps the DMA so it
        # never reads a fully out-of-bounds block -- we mask here instead.
        l_global = sp * num_l_per + li

        # Position validity mask: covers the 128-lane remainder, the ragged
        # last row-tile (partially OOB DMA -> undefined rows) and a clamped
        # duplicate tile from the core split.
        row = jax.lax.broadcasted_iota(jnp.int32, (1, tlb, _LANES), 1)
        lane = jax.lax.broadcasted_iota(jnp.int32, (1, tlb, _LANES), 2)
        pos = (l_global * tlb + row) * _LANES + lane
        valid = pos < L                                     # (1, tlb, 128) bool

        t = jnp.where(valid, tgt_ref[...].astype(jnp.int32), -1)      # (1, tlb, 128)
        p = jnp.where(valid, pred_ref[0].astype(jnp.float32), 0.0)    # (C, tlb, 128)

        # Softmax over the class axis (leading axis => cheap elementwise VPU).
        m = jnp.max(p, axis=0, keepdims=True)               # (1, tlb, 128)
        e = jnp.exp(p - m)                                  # EUP
        denom = jnp.sum(e, axis=0, keepdims=True)
        inv = pl.reciprocal(denom, approx=True)             # EUP
        inv = inv * (2.0 - denom * inv)                     # Newton -> ~f32 accurate
        inv = jnp.where(valid, inv, 0.0)                    # pre-mask probs once/pos
        probs = e * inv                                     # masked softmax probs

        cls = jax.lax.broadcasted_iota(jnp.int32, (C, tlb, _LANES), 0)
        match = t == cls                                    # bool one-hot (t=-1: none)

        # Lane-dense partial sums (C, 128): sublane-only reduce per tile,
        # cross-lane reduce deferred to the JAX glue.
        # TODO(synk): these row reductions could be offloaded to the idle MXU
        # (dot against a ones vector) to relieve the VALU slot on v7x / bf16.
        out_ref[0, 0, 0] += jnp.sum(jnp.where(match, probs, 0.0), axis=1)  # inter
        out_ref[0, 0, 1] += jnp.sum(probs * probs, axis=1)                 # sum p^2
        out_ref[0, 0, 2] += jnp.sum(match.astype(jnp.float32), axis=1)     # onehot ct

    partial = pl.pallas_call(
        kernel,
        out_shape=jax.ShapeDtypeStruct((splits, N, 3, C, _LANES), jnp.float32),
        grid_spec=pltpu.PrefetchScalarGridSpec(
            num_scalar_prefetch=0,
            grid=(splits, N, num_l_per),            # reduction axis (L tiles) last
            in_specs=[
                pl.BlockSpec(
                    (1, C, tlb, _LANES),
                    lambda sp, n, li: (n, 0,
                                       jnp.minimum(sp * num_l_per + li, num_l - 1), 0)),
                pl.BlockSpec(
                    (1, tlb, _LANES),
                    lambda sp, n, li: (n,
                                       jnp.minimum(sp * num_l_per + li, num_l - 1), 0)),
            ],
            out_specs=pl.BlockSpec((1, 1, 3, C, _LANES),
                                   lambda sp, n, li: (sp, n, 0, 0, 0)),
        ),
        compiler_params=pltpu.CompilerParams(
            dimension_semantics=("parallel", "parallel", "arbitrary"),
            vmem_limit_bytes=48 * 1024 * 1024,
        ),
    )(pred, tgt)                                    # (splits, N, 3, C, 128)

    # Tiny finalize in JAX: combine core-splits + cross-lane reduce, then dice.
    sums = jnp.sum(partial, axis=(0, 4))            # (N, 3, C)
    inter, s2, oh = sums[:, 0], sums[:, 1], sums[:, 2]
    dice_coef = (2.0 * inter + SMOOTH) / (s2 + oh + SMOOTH)
    if weight is not None:                          # module's optional re-weighting
        w = jnp.asarray(weight, jnp.float32)
        dice_coef = dice_coef * (w / jnp.sum(w)) * C
    return 1.0 - jnp.mean(dice_coef)


def _dice_loss_ref(predict, target, weight=None):
    """Pure-JAX reference mirroring the PyTorch forward (f32 math)."""
    N, C = predict.shape[:2]
    L = int(np.prod(predict.shape[2:]))
    p = jax.nn.softmax(predict.reshape(N, C, L).astype(jnp.float32), axis=1)
    onehot = jax.nn.one_hot(target.reshape(N, L), C, axis=1, dtype=jnp.float32)
    intersection = jnp.sum(p * onehot, axis=2)
    union = jnp.sum(p * p, axis=2) + jnp.sum(onehot, axis=2)
    dice_coef = (2.0 * intersection + SMOOTH) / (union + SMOOTH)
    if weight is not None:
        w = jnp.asarray(weight, jnp.float32)
        dice_coef = dice_coef * (w / jnp.sum(w)) * C
    return 1.0 - jnp.mean(dice_coef)


if __name__ == "__main__":
    key = jax.random.PRNGKey(0)
    k1, k2, k3, k4 = jax.random.split(key, 4)

    # Small shape from the module docstring: predict [N, C, H, W], target [N, H, W].
    N, C, H, W = 2, 4, 16, 16
    predict = jax.random.normal(k1, (N, C, H, W), dtype=jnp.float32)
    target = jax.random.randint(k2, (N, H, W), 0, C, dtype=jnp.int32)

    loss = jax.block_until_ready(dice_loss(predict, target))
    ref = jax.block_until_ready(_dice_loss_ref(predict, target))
    assert np.allclose(np.asarray(loss), np.asarray(ref), atol=1e-4, rtol=1e-4), (loss, ref)

    # bf16 logits path: halves HBM traffic, f32 math inside the kernel.
    predict_bf16 = predict.astype(jnp.bfloat16)
    loss_bf16 = jax.block_until_ready(dice_loss(predict_bf16, target))
    ref_bf16 = jax.block_until_ready(_dice_loss_ref(predict_bf16, target))
    assert np.allclose(np.asarray(loss_bf16), np.asarray(ref_bf16),
                       atol=1e-4, rtol=1e-4), (loss_bf16, ref_bf16)

    # Odd batch (N=1) + non-128-divisible spatial extent with a small forced
    # tile: exercises the lane-remainder mask, ragged (partially OOB) last
    # row-tile, the clamped duplicate tile and the 2-way core split.
    N2, H2, W2 = 1, 100, 100
    predict2 = jax.random.normal(k3, (N2, C, H2, W2), dtype=jnp.float32)
    target2 = jax.random.randint(k4, (N2, H2, W2), 0, C, dtype=jnp.int32)
    loss2 = jax.block_until_ready(dice_loss(predict2, target2, max_tile_rows=32))
    ref2 = jax.block_until_ready(_dice_loss_ref(predict2, target2))
    assert np.allclose(np.asarray(loss2), np.asarray(ref2), atol=1e-4, rtol=1e-4), (loss2, ref2)

    # Optional per-class re-weighting path.
    w = [1.0, 2.0, 0.5, 1.5]
    loss_w = jax.block_until_ready(dice_loss(predict, target, weight=w))
    ref_w = jax.block_until_ready(_dice_loss_ref(predict, target, weight=w))
    assert np.allclose(np.asarray(loss_w), np.asarray(ref_w), atol=1e-4, rtol=1e-4), (loss_w, ref_w)

    print("KERNEL_OK")
</pallas_src>

<mosaic_0001>
module attributes {stable_mosaic.version = 11 : i64} {
  func.func @kernel(%arg0: i32, %arg1: i32, %arg2: i32, %arg3: memref<1x4x2x128xf32, #tpu.memory_space<vmem>>, %arg4: memref<1x2x128xi8, #tpu.memory_space<vmem>>, %arg5: memref<1x1x3x4x128xf32, #tpu.memory_space<vmem>>) attributes {dimension_semantics = [#tpu.dimension_semantics<parallel>, #tpu.dimension_semantics<parallel>, #tpu.dimension_semantics<arbitrary>], iteration_bounds = array<i64: 1, 2, 1>, scalar_prefetch = 0 : i64, scratch_operands = 0 : i64, tpu.core_type = #tpu.core_type<tc>, window_params = [{transform_indices = @transform_0, window_bounds = array<i64: 1, 4, 2, 128>}, {transform_indices = @transform_1, window_bounds = array<i64: 1, 2, 128>}, {transform_indices = @transform_2, window_bounds = array<i64: 1, 1, 3, 4, 128>}]} {
    %c0_i32 = arith.constant 0 : i32
    %0 = arith.cmpi eq, %arg2, %c0_i32 : i32
    %1 = arith.extui %0 : i1 to i32
    %c0_i32_0 = arith.constant 0 : i32
    %2 = arith.cmpi ne, %1, %c0_i32_0 : i32
    scf.if %2 {
      %cst_43 = arith.constant 0.000000e+00 : f32
      %70 = vector.broadcast %cst_43 : f32 to vector<1x1x3x4x128xf32>
      %c0_44 = arith.constant 0 : index
      %c0_45 = arith.constant 0 : index
      %c0_46 = arith.constant 0 : index
      %c0_47 = arith.constant 0 : index
      %c0_48 = arith.constant 0 : index
      %71 = vector.load %arg5[%c0_44, %c0_45, %c0_46, %c0_47, %c0_48] : memref<1x1x3x4x128xf32, #tpu.memory_space<vmem>>, vector<1x1x3x4x128xf32>
      tpu.vector_store %arg5[%c0_44, %c0_45, %c0_46, %c0_47, %c0_48], %70 {strides = array<i32>} : memref<1x1x3x4x128xf32, #tpu.memory_space<vmem>>, vector<1x1x3x4x128xf32>,
    } else {
    }
    %c1_i32 = arith.constant 1 : i32
    %3 = arith.muli %arg0, %c1_i32 : i32
    %4 = arith.addi %3, %arg2 : i32
    %5 = tpu.iota {dimensions = array<i32: 1>} : vector<1x2x128xi32>
    %6 = tpu.iota {dimensions = array<i32: 2>} : vector<1x2x128xi32>
    %c2_i32 = arith.constant 2 : i32
    %7 = arith.muli %4, %c2_i32 : i32
    %8 = vector.broadcast %7 : i32 to vector<1x2x128xi32>
    %9 = arith.addi %8, %5 : vector<1x2x128xi32>
    %c128_i32 = arith.constant 128 : i32
    %10 = vector.broadcast %c128_i32 : i32 to vector<1x2x128xi32>
    %11 = arith.muli %9, %10 : vector<1x2x128xi32>
    %12 = arith.addi %11, %6 : vector<1x2x128xi32>
    %c256_i32 = arith.constant 256 : i32
    %13 = vector.broadcast %c256_i32 : i32 to vector<1x2x128xi32>
    %14 = arith.cmpi slt, %12, %13 : vector<1x2x128xi32>
    %c0 = arith.constant 0 : index
    %c0_1 = arith.constant 0 : index
    %c0_2 = arith.constant 0 : index
    %15 = vector.load %arg4[%c0, %c0_1, %c0_2] : memref<1x2x128xi8, #tpu.memory_space<vmem>>, vector<1x2x128xi8>
    %16 = arith.extsi %15 : vector<1x2x128xi8> to vector<1x2x128xi32>
    %c-1_i32 = arith.constant -1 : i32
    %17 = vector.broadcast %c-1_i32 : i32 to vector<1x2x128xi32>
    %18 = arith.select %14, %16, %17 : vector<1x2x128xi1>, vector<1x2x128xi32>
    %c0_3 = arith.constant 0 : index
    %c0_4 = arith.constant 0 : index
    %c0_5 = arith.constant 0 : index
    %c0_6 = arith.constant 0 : index
    %19 = vector.load %arg3[%c0_3, %c0_4, %c0_5, %c0_6] : memref<1x4x2x128xf32, #tpu.memory_space<vmem>>, vector<1x4x2x128xf32>
    %20 = vector.shape_cast %19 : vector<1x4x2x128xf32> to vector<4x2x128xf32>
    %cst = arith.constant 0.000000e+00 : f32
    %21 = vector.shape_cast %14 : vector<1x2x128xi1> to vector<1x2x128xi1>
    %22 = vector.broadcast %21 : vector<1x2x128xi1> to vector<4x2x128xi1>
    %23 = vector.broadcast %cst : f32 to vector<4x2x128xf32>
    %24 = arith.select %22, %20, %23 : vector<4x2x128xi1>, vector<4x2x128xf32>
    %cst_7 = arith.constant dense<0xFF800000> : vector<2x128xf32>
    %25 = vector.multi_reduction <maximumf>, %24, %cst_7 [0] : vector<4x2x128xf32> to vector<2x128xf32>
    %26 = vector.shape_cast %25 : vector<2x128xf32> to vector<1x2x128xf32>
    %27 = vector.broadcast %26 : vector<1x2x128xf32> to vector<4x2x128xf32>
    %28 = arith.subf %24, %27 : vector<4x2x128xf32>
    %29 = math.exp %28 : vector<4x2x128xf32>
    %cst_8 = arith.constant dense<0.000000e+00> : vector<2x128xf32>
    %30 = vector.multi_reduction <add>, %29, %cst_8 [0] : vector<4x2x128xf32> to vector<2x128xf32>
    %31 = vector.shape_cast %30 : vector<2x128xf32> to vector<1x2x128xf32>
    %32 = tpu.reciprocal %31 {approx = true} : vector<1x2x128xf32> -> vector<1x2x128xf32>
    %33 = arith.mulf %31, %32 : vector<1x2x128xf32>
    %cst_9 = arith.constant 2.000000e+00 : f32
    %34 = vector.broadcast %cst_9 : f32 to vector<1x2x128xf32>
    %35 = arith.subf %34, %33 : vector<1x2x128xf32>
    %36 = arith.mulf %32, %35 : vector<1x2x128xf32>
    %cst_10 = arith.constant 0.000000e+00 : f32
    %37 = vector.broadcast %cst_10 : f32 to vector<1x2x128xf32>
    %38 = arith.select %14, %36, %37 : vector<1x2x128xi1>, vector<1x2x128xf32>
    %39 = vector.broadcast %38 : vector<1x2x128xf32> to vector<4x2x128xf32>
    %40 = arith.mulf %29, %39 : vector<4x2x128xf32>
    %41 = tpu.iota {dimensions = array<i32: 0>} : vector<4x2x128xi32>
    %42 = vector.broadcast %18 : vector<1x2x128xi32> to vector<4x2x128xi32>
    %43 = arith.cmpi eq, %42, %41 : vector<4x2x128xi32>
    %c0_11 = arith.constant 0 : index
    %c0_12 = arith.constant 0 : index
    %c0_13 = arith.constant 0 : index
    %c0_14 = arith.constant 0 : index
    %c0_15 = arith.constant 0 : index
    %44 = vector.load %arg5[%c0_11, %c0_12, %c0_13, %c0_14, %c0_15] : memref<1x1x3x4x128xf32, #tpu.memory_space<vmem>>, vector<1x1x1x4x128xf32>
    %45 = vector.shape_cast %44 : vector<1x1x1x4x128xf32> to vector<4x128xf32>
    %cst_16 = arith.constant 0.000000e+00 : f32
    %46 = vector.broadcast %cst_16 : f32 to vector<4x2x128xf32>
    %47 = arith.select %43, %40, %46 : vector<4x2x128xi1>, vector<4x2x128xf32>
    %cst_17 = arith.constant dense<0.000000e+00> : vector<4x128xf32>
    %48 = vector.multi_reduction <add>, %47, %cst_17 [1] : vector<4x2x128xf32> to vector<4x128xf32>
    %49 = arith.addf %45, %48 : vector<4x128xf32>
    %c0_18 = arith.constant 0 : index
    %c0_19 = arith.constant 0 : index
    %c0_20 = arith.constant 0 : index
    %c0_21 = arith.constant 0 : index
    %c0_22 = arith.constant 0 : index
    %50 = vector.load %arg5[%c0_18, %c0_19, %c0_20, %c0_21, %c0_22] : memref<1x1x3x4x128xf32, #tpu.memory_space<vmem>>, vector<1x1x1x4x128xf32>
    %51 = vector.shape_cast %50 : vector<1x1x1x4x128xf32> to vector<4x128xf32>
    %52 = vector.shape_cast %49 : vector<4x128xf32> to vector<1x1x1x4x128xf32>
    tpu.vector_store %arg5[%c0_18, %c0_19, %c0_20, %c0_21, %c0_22], %52 {strides = array<i32>} : memref<1x1x3x4x128xf32, #tpu.memory_space<vmem>>, vector<1x1x1x4x128xf32>,
    %c0_23 = arith.constant 0 : index
    %c0_24 = arith.constant 0 : index
    %c1 = arith.constant 1 : index
    %c0_25 = arith.constant 0 : index
    %c0_26 = arith.constant 0 : index
    %53 = vector.load %arg5[%c0_23, %c0_24, %c1, %c0_25, %c0_26] : memref<1x1x3x4x128xf32, #tpu.memory_space<vmem>>, vector<1x1x1x4x128xf32>
    %54 = vector.shape_cast %53 : vector<1x1x1x4x128xf32> to vector<4x128xf32>
    %55 = arith.mulf %40, %40 : vector<4x2x128xf32>
    %cst_27 = arith.constant dense<0.000000e+00> : vector<4x128xf32>
    %56 = vector.multi_reduction <add>, %55, %cst_27 [1] : vector<4x2x128xf32> to vector<4x128xf32>
    %57 = arith.addf %54, %56 : vector<4x128xf32>
    %c0_28 = arith.constant 0 : index
    %c0_29 = arith.constant 0 : index
    %c1_30 = arith.constant 1 : index
    %c0_31 = arith.constant 0 : index
    %c0_32 = arith.constant 0 : index
    %58 = vector.load %arg5[%c0_28, %c0_29, %c1_30, %c0_31, %c0_32] : memref<1x1x3x4x128xf32, #tpu.memory_space<vmem>>, vector<1x1x1x4x128xf32>
    %59 = vector.shape_cast %58 : vector<1x1x1x4x128xf32> to vector<4x128xf32>
    %60 = vector.shape_cast %57 : vector<4x128xf32> to vector<1x1x1x4x128xf32>
    tpu.vector_store %arg5[%c0_28, %c0_29, %c1_30, %c0_31, %c0_32], %60 {strides = array<i32>} : memref<1x1x3x4x128xf32, #tpu.memory_space<vmem>>, vector<1x1x1x4x128xf32>,
    %c0_33 = arith.constant 0 : index
    %c0_34 = arith.constant 0 : index
    %c2 = arith.constant 2 : index
    %c0_35 = arith.constant 0 : index
    %c0_36 = arith.constant 0 : index
    %61 = vector.load %arg5[%c0_33, %c0_34, %c2, %c0_35, %c0_36] : memref<1x1x3x4x128xf32, #tpu.memory_space<vmem>>, vector<1x1x1x4x128xf32>
    %62 = vector.shape_cast %61 : vector<1x1x1x4x128xf32> to vector<4x128xf32>
    %63 = arith.extui %43 : vector<4x2x128xi1> to vector<4x2x128xi32>
    %64 = arith.sitofp %63 : vector<4x2x128xi32> to vector<4x2x128xf32>
    %cst_37 = arith.constant dense<0.000000e+00> : vector<4x128xf32>
    %65 = vector.multi_reduction <add>, %64, %cst_37 [1] : vector<4x2x128xf32> to vector<4x128xf32>
    %66 = arith.addf %62, %65 : vector<4x128xf32>
    %c0_38 = arith.constant 0 : index
    %c0_39 = arith.constant 0 : index
    %c2_40 = arith.constant 2 : index
    %c0_41 = arith.constant 0 : index
    %c0_42 = arith.constant 0 : index
    %67 = vector.load %arg5[%c0_38, %c0_39, %c2_40, %c0_41, %c0_42] : memref<1x1x3x4x128xf32, #tpu.memory_space<vmem>>, vector<1x1x1x4x128xf32>
    %68 = vector.shape_cast %67 : vector<1x1x1x4x128xf32> to vector<4x128xf32>
    %69 = vector.shape_cast %66 : vector<4x128xf32> to vector<1x1x1x4x128xf32>
    tpu.vector_store %arg5[%c0_38, %c0_39, %c2_40, %c0_41, %c0_42], %69 {strides = array<i32>} : memref<1x1x3x4x128xf32, #tpu.memory_space<vmem>>, vector<1x1x1x4x128xf32>,
    return
  }
  func.func @transform_0(%arg0: i32, %arg1: i32, %arg2: i32) -> (i32, i32, i32, i32) {
    %c1_i32 = arith.constant 1 : i32
    %0 = arith.muli %arg0, %c1_i32 : i32
    %1 = arith.addi %0, %arg2 : i32
    %c0_i32 = arith.constant 0 : i32
    %2 = arith.minsi %1, %c0_i32 : i32
    %c0_i32_0 = arith.constant 0 : i32
    %c0_i32_1 = arith.constant 0 : i32
    %c0_i32_2 = arith.constant 0 : i32
    return %arg1, %c0_i32_0, %2, %c0_i32_1 : i32, i32, i32, i32
  }
  func.func @transform_1(%arg0: i32, %arg1: i32, %arg2: i32) -> (i32, i32, i32) {
    %c1_i32 = arith.constant 1 : i32
    %0 = arith.muli %arg0, %c1_i32 : i32
    %1 = arith.addi %0, %arg2 : i32
    %c0_i32 = arith.constant 0 : i32
    %2 = arith.minsi %1, %c0_i32 : i32
    %c0_i32_0 = arith.constant 0 : i32
    %c0_i32_1 = arith.constant 0 : i32
    return %arg1, %2, %c0_i32_0 : i32, i32, i32
  }
  func.func @transform_2(%arg0: i32, %arg1: i32, %arg2: i32) -> (i32, i32, i32, i32, i32) {
    %c0_i32 = arith.constant 0 : i32
    %c0_i32_0 = arith.constant 0 : i32
    %c0_i32_1 = arith.constant 0 : i32
    %c0_i32_2 = arith.constant 0 : i32
    return %arg0, %arg1, %c0_i32, %c0_i32_0, %c0_i32_1 : i32, i32, i32, i32, i32
  }
}

</mosaic_0001>

<bundles_post_ra>
// kernel: tpu_custom_call.1
= control target key start
LH: loop header
LB: loop body
LE: loop exit
PB: predicated region body
PF: predicated region fallthrough
CT: control target
= control target key end

     0   :  { %7 = vsyncpa [#allocation3], 0  ;;  %s1076_s0 = inlined_call_operand.hbm [shape: f32[2,4,2,128], index: 0, kind: input, shape index: {}]   ;;  %s1077_s1 = inlined_call_operand.hbm [shape: s8[2,2,128], index: 1, kind: input, shape index: {}]   ;;  %s1078_s2 = inlined_call_operand.hbm [shape: f32[1,2,3,4,128], index: 2, kind: output, shape index: {}]  }
   0x1   :  { %9 = vsyncpa [#allocation3 + $0x1], 0 }
   0x2   :  { %10 = vsyncpa [#allocation6], 0 }
   0x3   :  { %12 = vsyncpa [#allocation6 + $0x1], 0 }
   0x4   :  { %13 = vsyncpa [#allocation4], 0 }
   0x5   :  { %15 = vsyncpa [#allocation4 + $0x1], 0  ;;  %s859_s9 = smov 0   ;;  %s861_s10 = smov 0  }
   0x6   :  { %s863_s11 = smov 0   ;;  %s865_s12 = smov 0  }
   0x7   :  { %s867_s13 = smov 0   ;;  %s869_s14 = smov 0  }
   0x8 LB: > { %s586_s15 = sadd.s32 4294967295, %s837_s14   ;;  %s587_s16 = sadd.s32 4294967294, %s837_s14   ;;  %s837_s14 = sphi %s869_s14, %s21_s14   ;;  %s833_s13 = sphi %s867_s13, %s1088_s13   ;;  %s829_s12 = sphi %s865_s12, %s1087_s12   ;;  %s825_s11 = sphi %s863_s11, %s1086_s11   ;;  %s821_s10 = sphi %s861_s10, %s1085_s10   ;;  %s817_s9 = sphi %s859_s9, %s1084_s9  }
   0x9   : > { %s36_s17 = sadd.s32 1, %s833_s13  ;;  %s55_s18 = sadd.s32 1, %s825_s11 }
   0xa   : > { %p38_p0 = scmp.ge.s32.totalorder %s36_s17, 2  ;;  %p62_p1 = scmp.ne.s32.totalorder %s825_s11, %s821_s10 }
   0xb   : > { %p63_p2 = scmp.eq.s32.totalorder %s837_s14, 0  ;;  %p68_p3 = scmp.ne.s32.totalorder %s821_s10, %s817_s9 }
   0xc   : > { %s1090_s17 = smov (%p38_p0, %s36_s17), 0  ;;  %p69_p5 = scmp.eq.s32.totalorder %s586_s15, 0 }
   0xd   : > { %p900_p4 = por %p63_p2, %p62_p1  ;;  %s50_s20 = ssub.s32 %s833_s13, %s1090_s17 }
   0xe   : > { %p128_p6 = scmp.eq.s32.totalorder %s586_s15, 1  ;;  %p53_p7 = scmp.eq.s32.totalorder %s50_s20, 0 }
   0xf   : > { %p906_p8 = por %p69_p5, %p68_p3  ;;  %p134_p10 = scmp.eq.s32.totalorder %s587_s16, 1 }
  0x10   : > { %p910_p9 = por %p128_p6, %p62_p1  ;;  %p589_p12 = scmp.ge.s32.totalorder %s837_s14, 2 }
  0x11   : > { %s915_s23 = scalar_select %p53_p7, %s825_s11, %s55_s18  }
  0x12   : > { %p917_p11 = por %p134_p10, %p68_p3  ;;  %p626_p13 = scmp.lt.s32.totalorder %s837_s14, 2 }
  0x13   : > { %s154_s25 = sand.u32 1, %s825_s11   ;;  %s606_s27 = sshll.u32 %s833_s13, 3 }
  0x14   : > { %s590_s26 = sshll.u32 %s154_s25, 3  ;;  %s167_s30 = scalar_lea.hbm %s1076_s0, %s606_s27 }
  0x15   : > { %s158_s3 = scalar_lea.vmem [#allocation2], %s590_s26  ;;  %s168_s5 = sshll.u32 %s167_s30, 4  ;;  %s169_s5 = int_to_ptr.hbm [resolvable:$true] %s168_s5 }
  0x16   : > { %s170_s4 = sshll.u32 %s158_s3, 4  ;;  %p930_p0 = pnand %p626_p13, %p900_p4  ;;  %s171_s4 = int_to_ptr.vmem [resolvable:$true] %s170_s4 }
  0x17   : > { %p593_p1 = scmp.ge.s32.totalorder %s837_s14, 1  ;;  %s155_s7 = scalar_lea.sflag [#allocation3], %s154_s25 }
  0x18   : > { %s839_s8 = smov 32   ;;  %s840_s15 = smov 2  }
  0x19   : > { %618 = dma.hbm_to_vmem [thread:$0]  (!%p930_p0), %s169_s5, 128, %s171_s4, %s155_s7, %s839_s8, %s839_s8, %s840_s15  }
  0x1a   : > { %p199_p2 = scmp.lt.s32.totalorder %s837_s14, 3  ;;  %s190_s20 = scalar_lea.hbm %s1077_s1, %s833_s13 }
  0x1b   : > { %s192_s26 = sshll.u32 %s190_s20, 4  ;;  %s183_s19 = scalar_lea.vmem [#allocation5], %s154_s25  ;;  %s193_s26 = int_to_ptr.hbm [resolvable:$true] %s192_s26 }
  0x1c   : > { %p200_p3 = pnand %p593_p1, %p199_p2  ;;  %s194_s27 = sshll.u32 %s183_s19, 4  ;;  %s195_s27 = int_to_ptr.vmem [resolvable:$true] %s194_s27 }
  0x1d   : > { %s181_s28 = scalar_lea.sflag [#allocation6], %s154_s25  ;;  %s945_s29 = sand.u32 (!%p200_p3), 1, %s821_s10  }
  0x1e   : > { %621 = dma.hbm_to_vmem [thread:$0]  (!%p930_p0), %s193_s26, 16, %s195_s27, %s181_s28  }
  0x1f   : > { %203 = sbr.rel (%p200_p3) target bundleno = 117 (0x75), region = 28  ;;  %s594_s30 = sshll.u32 (!%p200_p3), %s945_s29, 3 }
  0x20   : > { %s206_s3 = scalar_lea.sflag (!%p200_p3), [#allocation3], %s945_s29  ;;  %s209_s4 = scalar_lea.vmem (!%p200_p3), [#allocation2], %s594_s30 }
  0x24   : > { %804 = dma.done.wait (%p906_p8), %s206_s3, 128  }
  0x25   : > { %806 = vsyncadd (%p906_p8), %s206_s3, 4294967168  ;;  %s216_s25 = scalar_lea.sflag [#allocation6], %s945_s29  ;;  %s218_s5 = scalar_lea.vmem [#allocation5], %s945_s29 }
  0x26   : > { %808 = dma.done.wait (%p906_p8), %s216_s25, 16  }
  0x27   : > { %810 = vsyncadd (%p906_p8), %s216_s25, 4294967280  ;;  %s607_s6 = smul.u32 12, %s945_s29  ;;  %v258_v0 = vlaneseq  ;;  %v841_v3 = vmov 0.0   ;;  %v271_v6 = vld [vmem:[%s209_s4] sm:$0x3]  ;;  %vm281_vm0 = vcmask 1041408  }
  0x28   : > { %v272_v7 = vld [vmem:[%s209_s4 + $0x2] sm:$0x3]  ;;  %v273_v8 = vld [vmem:[%s209_s4 + $0x4] sm:$0x3]  ;;  %v274_v9 = vld [vmem:[%s209_s4 + $0x6] sm:$0x3] }
  0x29   : > { %v259_v1 = vshrl.u32 %v258_v0, 7  ;;  %v261_v2 = vand.u32 127, %v258_v0  ;;  %s960_s7 = scalar_lea.vmem [#allocation7], %s607_s6  ;;  %v268_v14 = vld [vmem:[%s218_s5] sm:$0x1]  ;;  %vm358_vm6 = vcmask 1041409  }
  0x2a   : > { %254 = vst [vmem:[%s960_s7] sm:$0xf] %v841_v3  ;;  %v269_v21 = vunpack.c.0.s8 %v268_v14  ;;  %vm360_vm7 = vcmask 1042434   ;;  %vm362_vm8 = vcmask 1043459   ;;  %s608_s21 = smul.u32 12, %s829_s12  ;;  %s474_s16 = sshll.u32 %s960_s7, 4  ;;  %s475_s16 = int_to_ptr.vmem [resolvable:$true] %s474_s16 }
  0x2b   : > { %255 = vst [vmem:[%s960_s7 + $0x4] sm:$0xf] %v841_v3  ;;  %v265_v4 = vmul.u32 128, %v259_v1  ;;  %s460_s20 = scalar_lea.sflag [#allocation4], %s945_s29  ;;  %s771_s30 = scalar_lea.hbm %s1078_s2, 24 }
  0x2c   : > { %256 = vst [vmem:[%s960_s7 + $0x8] sm:$0xf] %v841_v3  ;;  %s473_s15 = scalar_lea.hbm %s1078_s2, %s608_s21 }
  0x2d   : > { %v965_v5 = vadd.s32 %v265_v4, %v261_v2  ;;  %s476_s18 = sshll.u32 %s473_s15, 4  ;;  %s477_s18 = int_to_ptr.hbm [resolvable:$true] %s476_s18 }
  0x2e   : > { %s765_s26 = sshra.s32 %s477_s18, 4  ;;  %s766_s26 = int_to_ptr.hbm [resolvable:$true] %s765_s26 }
  0x2f   : > { %vm267_vm1 = vcmp.lt.s32.totalorder %v965_v5, 256  ;;  %s767_s19 = scalar_lea.hbm %s766_s26, 12  ;;  %p772_p7 = scmp.lt.s32.totalorder %s766_s26, %s1078_s2 }
  0x30   : > { %v277_v10 = vsel %vm267_vm1, %v271_v6, 0.0  ;;  %v278_v11 = vsel %vm267_vm1, %v272_v7, 0.0  ;;  %v279_v12 = vsel %vm267_vm1, %v273_v8, 0.0  ;;  %v280_v13 = vsel %vm267_vm1, %v274_v9, 0.0  ;;  %p768_p4 = scmp.ne.s32.totalorder %s766_s26, %s767_s19  ;;  %p773_p8 = scmp.lt.s32.totalorder %s771_s30, %s767_s19 }
  0x31   : > { %v282_v15 = vsel %vm281_vm0, %v277_v10, -inf  ;;  %v283_v16 = vsel %vm281_vm0, %v278_v11, -inf  ;;  %v284_v17 = vsel %vm281_vm0, %v279_v12, -inf  ;;  %v285_v18 = vsel %vm281_vm0, %v280_v13, -inf }
  0x32   : > { %v286_v19 = vmax.f32 %v282_v15, %v283_v16  ;;  %v287_v20 = vmax.f32 %v284_v17, %v285_v18  ;;  %v982_v27 = vsel %vm267_vm1, %v269_v21, 4294967295  ;;  %p769_p5 = pnand %p768_p4, %p910_p9  ;;  %p774_p10 = por %p773_p8, %p772_p7 }
  0x33   : > { %vm317_vm2 = vcmp.eq.s32.totalorder %v982_v27, 0  ;;  %vm318_vm3 = vcmp.eq.s32.totalorder %v982_v27, 1  ;;  %vm319_vm4 = vcmp.eq.s32.totalorder %v982_v27, 2  ;;  %vm320_vm5 = vcmp.eq.s32.totalorder %v982_v27, 3  ;;  %v597_v14 = vld [vmem:[%s960_s7 + $0x8] sm:$0xf] }
  0x34   : > { %v288_v22 = vmax.f32 %v286_v19, %v287_v20  ;;  %v598_v32 = vsel %vm317_vm2, 1.0, %v841_v3  ;;  %v599_v33 = vsel %vm318_vm3, 1.0, %v841_v3  ;;  %v600_v34 = vsel %vm319_vm4, 1.0, %v841_v3  ;;  %p770_p6 = pneg %p769_p5 }
  0x35   : > { %v421_v35 = vsel %vm281_vm0, %v598_v32, 0.0  ;;  %v428_v36 = vsel %vm281_vm0, %v599_v33, 0.0  ;;  %v601_v38 = vsel %vm320_vm5, 1.0, %v841_v3  ;;  %v435_v41 = vsel %vm281_vm0, %v600_v34, 0.0 }
  0x36   : > { %v289_v23 = vsub.f32 %v277_v10, %v288_v22  ;;  %v290_v24 = vsub.f32 %v278_v11, %v288_v22  ;;  %v291_v25 = vsub.f32 %v279_v12, %v288_v22  ;;  %v292_v26 = vsub.f32 %v280_v13, %v288_v22  ;;  %p775_p13 = pnand %p774_p10, %p770_p6 }
  0x37   : > { %v422_v39 = vrot.slane %v421_v35, 4  ;;  %v429_v40 = vrot.slane %v428_v36, 4  ;;  %v436_v44 = vrot.slane %v435_v41, 4  ;;  %v442_v45 = vsel %vm281_vm0, %v601_v38, 0.0 }
  0x38   : > { %v293_v28 = vmul.f32 1.442695, %v289_v23  ;;  %v295_v29 = vmul.f32 1.442695, %v290_v24  ;;  %v297_v30 = vmul.f32 1.442695, %v291_v25 }
  0x39   : > { %v299_v31 = vmul.f32 1.442695, %v292_v26  ;;  %v423_v48 = vadd.f32 %v422_v39, %v421_v35  ;;  %v430_v49 = vadd.f32 %v429_v40, %v428_v36  ;;  %v443_v50 = vrot.slane %v442_v45, 4 }
  0x3a   : > { %681 = vpow2.f32 %v293_v28  ;;  %v437_v54 = vadd.f32 %v436_v44, %v435_v41 }
  0x3b   : > { %683 = vpow2.f32 %v295_v29  ;;  %v424_v56 = vrot.slane %v423_v48, 2  ;;  %v431_v57 = vrot.slane %v430_v49, 2  ;;  %v444_v58 = vadd.f32 %v443_v50, %v442_v45 }
  0x3c   : > { %685 = vpow2.f32 %v297_v30  ;;  %v438_v60 = vrot.slane %v437_v54, 2 }
  0x3d   : > { %687 = vpow2.f32 %v299_v31  ;;  %v425_v61 = vadd.f32 %v424_v56, %v423_v48  ;;  %v432_v62 = vadd.f32 %v431_v57, %v430_v49  ;;  %v445_v63 = vrot.slane %v444_v58, 2 }
  0x3e   : > { %v439_v1 = vadd.f32 %v438_v60, %v437_v54 }
  0x3f   : > { %v426_v2 = vrot.slane %v425_v61, 1  ;;  %v433_v3 = vrot.slane %v432_v62, 1  ;;  %v446_v4 = vadd.f32 %v445_v63, %v444_v58 }
  0x40   : > { %v682_v37 = vpop.eup %681  ;;  %v440_v6 = vrot.slane %v439_v1, 1 }
  0x41   : > { %v684_v42 = vpop.eup %683  ;;  %v301_v43 = vsel %vm281_vm0, %v682_v37, 0.0  ;;  %v427_v7 = vadd.f32 %v426_v2, %v425_v61  ;;  %v434_v8 = vadd.f32 %v433_v3, %v432_v62  ;;  %v447_v9 = vrot.slane %v446_v4, 1 }
  0x42   : > { %v686_v46 = vpop.eup %685  ;;  %v302_v47 = vsel %vm281_vm0, %v684_v42, 0.0  ;;  %v441_v10 = vadd.f32 %v440_v6, %v439_v1 }
  0x43   : > { %v688_v51 = vpop.eup %687  ;;  %v303_v52 = vadd.f32 %v302_v47, %v301_v43  ;;  %v304_v53 = vsel %vm281_vm0, %v686_v46, 0.0  ;;  %v448_v11 = vadd.f32 %v447_v9, %v446_v4  ;;  %v453_v12 = vsel %vm358_vm6, %v434_v8, %v427_v7 }
  0x44   : > { %v306_v55 = vsel %vm281_vm0, %v688_v51, 0.0  ;;  %v454_v13 = vsel %vm360_vm7, %v441_v10, %v453_v12 }
  0x45   : > { %v305_v59 = vadd.f32 %v304_v53, %v303_v52  ;;  %v455_v15 = vsel %vm362_vm8, %v448_v11, %v454_v13 }
  0x46   : > { %v457_v17 = vadd.f32 %v597_v14, %v455_v15 }
  0x47   : > { %v307_v0 = vadd.f32 %v306_v55, %v305_v59 }
  0x48   : > { %602 = vst [vmem:[%s960_s7 + $0x8] sm:$0xf] %v457_v17 }
  0x49   : > { %689 = vrcp.f32 %v307_v0 }
  0x4f   : > { %v690_v16 = vpop.eup %689 }
  0x50   : > { %v309_v18 = vmul.f32 %v690_v16, %v307_v0 }
  0x52   : > { %v310_v19 = vsub.f32 2.0, %v309_v18  ;;  %v321_v18 = vld [vmem:[%s960_s7] sm:$0xf] }
  0x54   : > { %v311_v20 = vmul.f32 %v690_v16, %v310_v19 }
  0x56   : > { %v312_v21 = vsel %vm267_vm1, %v311_v20, 0.0 }
  0x57   : > { %v313_v22 = vmul.f32 %v682_v37, %v312_v21  ;;  %v314_v23 = vmul.f32 %v684_v42, %v312_v21  ;;  %v315_v24 = vmul.f32 %v686_v46, %v312_v21  ;;  %v316_v25 = vmul.f32 %v688_v51, %v312_v21 }
  0x59   : > { %v322_v26 = vsel %vm317_vm2, %v313_v22, 0.0  ;;  %v323_v28 = vsel %vm318_vm3, %v314_v23, 0.0  ;;  %v324_v29 = vsel %vm319_vm4, %v315_v24, 0.0  ;;  %v325_v30 = vsel %vm320_vm5, %v316_v25, 0.0 }
  0x5a   : > { %v326_v31 = vsel %vm281_vm0, %v322_v26, 0.0  ;;  %v333_v5 = vsel %vm281_vm0, %v323_v28, 0.0  ;;  %v340_v32 = vsel %vm281_vm0, %v324_v29, 0.0  ;;  %v347_v33 = vsel %vm281_vm0, %v325_v30, 0.0 }
  0x5b   : > { %v327_v34 = vrot.slane %v326_v31, 4  ;;  %v334_v35 = vrot.slane %v333_v5, 4  ;;  %v341_v36 = vrot.slane %v340_v32, 4  ;;  %v348_v37 = vrot.slane %v347_v33, 4 }
  0x5c   : > { %v369_v38 = vmul.f32 %v313_v22, %v313_v22  ;;  %v370_v39 = vmul.f32 %v314_v23, %v314_v23  ;;  %v371_v40 = vmul.f32 %v315_v24, %v315_v24  ;;  %v372_v41 = vmul.f32 %v316_v25, %v316_v25 }
  0x5d   : > { %v328_v42 = vadd.f32 %v327_v34, %v326_v31  ;;  %v335_v43 = vadd.f32 %v334_v35, %v333_v5  ;;  %v342_v27 = vadd.f32 %v341_v36, %v340_v32  ;;  %v349_v44 = vadd.f32 %v348_v37, %v347_v33  ;;  %v595_v5 = vld [vmem:[%s960_s7 + $0x4] sm:$0xf] }
  0x5e   : > { %v373_v45 = vsel %vm281_vm0, %v369_v38, 0.0  ;;  %v380_v46 = vsel %vm281_vm0, %v370_v39, 0.0  ;;  %v387_v47 = vsel %vm281_vm0, %v371_v40, 0.0  ;;  %v394_v48 = vsel %vm281_vm0, %v372_v41, 0.0 }
  0x5f   : > { %v329_v49 = vrot.slane %v328_v42, 2  ;;  %v336_v50 = vrot.slane %v335_v43, 2  ;;  %v343_v51 = vrot.slane %v342_v27, 2  ;;  %v350_v52 = vrot.slane %v349_v44, 2 }
  0x60   : > { %v374_v53 = vrot.slane %v373_v45, 4  ;;  %v381_v54 = vrot.slane %v380_v46, 4  ;;  %v388_v55 = vrot.slane %v387_v47, 4  ;;  %v395_v56 = vrot.slane %v394_v48, 4 }
  0x61   : > { %v330_v57 = vadd.f32 %v329_v49, %v328_v42  ;;  %v337_v58 = vadd.f32 %v336_v50, %v335_v43  ;;  %v344_v59 = vadd.f32 %v343_v51, %v342_v27  ;;  %v351_v60 = vadd.f32 %v350_v52, %v349_v44 }
  0x62   : > { %v375_v61 = vadd.f32 %v374_v53, %v373_v45  ;;  %v382_v62 = vadd.f32 %v381_v54, %v380_v46  ;;  %v389_v63 = vadd.f32 %v388_v55, %v387_v47  ;;  %v396_v0 = vadd.f32 %v395_v56, %v394_v48 }
  0x63   : > { %v331_v1 = vrot.slane %v330_v57, 1  ;;  %v338_v2 = vrot.slane %v337_v58, 1  ;;  %v345_v3 = vrot.slane %v344_v59, 1  ;;  %v352_v4 = vrot.slane %v351_v60, 1 }
  0x64   : > { %v376_v6 = vrot.slane %v375_v61, 2  ;;  %v383_v7 = vrot.slane %v382_v62, 2  ;;  %v390_v8 = vrot.slane %v389_v63, 2  ;;  %v397_v9 = vrot.slane %v396_v0, 2 }
  0x65   : > { %v332_v10 = vadd.f32 %v331_v1, %v330_v57  ;;  %v339_v11 = vadd.f32 %v338_v2, %v337_v58  ;;  %v346_v12 = vadd.f32 %v345_v3, %v344_v59  ;;  %v353_v13 = vadd.f32 %v352_v4, %v351_v60 }
  0x66   : > { %v377_v14 = vadd.f32 %v376_v6, %v375_v61  ;;  %v384_v15 = vadd.f32 %v383_v7, %v382_v62  ;;  %v391_v16 = vadd.f32 %v390_v8, %v389_v63  ;;  %v398_v17 = vadd.f32 %v397_v9, %v396_v0 }
  0x67   : > { %v359_v19 = vsel %vm358_vm6, %v339_v11, %v332_v10 }
  0x68   : > { %v361_v20 = vsel %vm360_vm7, %v346_v12, %v359_v19  ;;  %v378_v21 = vrot.slane %v377_v14, 1  ;;  %v385_v22 = vrot.slane %v384_v15, 1  ;;  %v392_v23 = vrot.slane %v391_v16, 1 }
  0x69   : > { %v363_v24 = vsel %vm362_vm8, %v353_v13, %v361_v20  ;;  %v399_v25 = vrot.slane %v398_v17, 1 }
  0x6a   : > { %v365_v26 = vadd.f32 %v363_v24, %v321_v18  ;;  %v379_v28 = vadd.f32 %v378_v21, %v377_v14  ;;  %v386_v29 = vadd.f32 %v385_v22, %v384_v15  ;;  %v393_v30 = vadd.f32 %v392_v23, %v391_v16 }
  0x6b   : > { %v400_v31 = vadd.f32 %v399_v25, %v398_v17 }
  0x6c   : > { %366 = vst [vmem:[%s960_s7] sm:$0xf] %v365_v26  ;;  %v405_v32 = vsel %vm358_vm6, %v386_v29, %v379_v28 }
  0x6d   : > { %v406_v33 = vsel %vm360_vm7, %v393_v30, %v405_v32 }
  0x6e   : > { %v407_v34 = vsel %vm362_vm8, %v400_v31, %v406_v33 }
  0x6f   : > { %v409_v35 = vadd.f32 %v595_v5, %v407_v34 }
  0x71   : > { %596 = vst [vmem:[%s960_s7 + $0x4] sm:$0xf] %v409_v35 }
  0x72   : > { %778 = shalt.err (!%p775_p13)
}
  0x73   : > { %s842_s29 = smov 64   ;;  %s843_s25 = smov 4  }
  0x74   : > { %613 = dma.vmem_to_hbm [thread:$0]  (%p910_p9), %s475_s16, 192, %s477_s18, %s460_s20, %s842_s29, %s842_s29, %s843_s25  }
  0x75 PF: > { %s491_s5 = sand.u32 1, %s817_s9   ;;  %p623_p0 = pnand %p589_p12, %p917_p11 }
  0x76   : > { %s492_s6 = scalar_lea.sflag [#allocation4], %s491_s5 }
  0x77   : > { %p624_p1 = pneg %p623_p0 }
  0x79   : > { %812 = dma.done.wait (%p624_p1), %s492_s6, 192  }
  0x7a   : > { %814 = vsyncadd (%p624_p1), %s492_s6, 4294967104  ;;  %s21_s14 = sadd.s32 1, %s837_s14   ;;  %s1084_s9 = smov %s821_s10 }
  0x7b   : > { %p18_p2 = scmp.ge.s32.totalorder %s21_s14, 4   ;;  %s1085_s10 = smov %s825_s11 }
  0x7c   : > { %s1086_s11 = smov %s915_s23  ;;  %s1087_s12 = smov %s833_s13 }
  0x7d   : > { %s1088_s13 = smov %s1090_s17  ;;  %20 = sbr.rel (!%p18_p2) target bundleno = 8 (0x8), region = 92 }
  0x82   :  { %498 = vsyncpa [#allocation3], 1 }
  0x83   :  { %500 = vsyncpa [#allocation3 + $0x1], 1 }
  0x84   :  { %501 = vsyncpa [#allocation6], 1 }
  0x85   :  { %503 = vsyncpa [#allocation6 + $0x1], 1 }
  0x86   :  { %504 = vsyncpa [#allocation4], 1 }
  0x87   :  { %506 = vsyncpa [#allocation4 + $0x1], 1 }

</bundles_post_ra>
